<compile_context>
chip_gen: v5e
topology: v5e:2x2
jax: 0.10.0
libtpu: 0.0.40
codegen_flags: <defaults>
</compile_context>

<pallas_src>
from functools import partial

import jax
import jax.numpy as jnp
from jax.experimental import pallas as pl
from jax.experimental.pallas import tpu as pltpu

LANE = 128
SUBLANE = 8


def _round_up(n, m):
    return ((n + m - 1) // m) * m


def dqn_kernel(x_ref, w1_ref, b1_ref, w2_ref, b2_ref, o_ref):
    # fc1: bf16 operands on the MXU, f32 accumulation.
    h = jnp.dot(x_ref[...], w1_ref[...], preferred_element_type=jnp.float32)
    # f32 epilogue (bias broadcast over the batch tile + ReLU) stays in vregs.
    h = jnp.maximum(h + b1_ref[...], 0.0)
    # fc3: cast hidden back to the MXU dtype; W2 is lane-padded to 128 outputs,
    # so the final store is an unmasked, lane-dense vst.
    out = jnp.dot(h.astype(w2_ref.dtype), w2_ref[...],
                  preferred_element_type=jnp.float32)
    o_ref[...] = (out + b2_ref[...]).astype(o_ref.dtype)


def prepare_params(w1, b1, w2, b2, mxu_dtype=jnp.bfloat16):
    """One-time parameter prep (call once, outside the forward hot path).

    - Casts W1/W2 to the MXU input dtype (bf16 by default).
    - Zero-pads the output layer (W2, b2) to a multiple of 128 lanes so the
      kernel's final store is lane-dense.
    - Keeps biases in f32 for the f32 epilogue.
    """
    H, A = w2.shape
    n_pad = _round_up(max(A, LANE), LANE)
    w1_c = w1.astype(mxu_dtype)
    b1_c = b1.astype(jnp.float32).reshape(1, -1)
    w2_p = jnp.zeros((H, n_pad), mxu_dtype).at[:, :A].set(w2.astype(mxu_dtype))
    b2_p = jnp.zeros((1, n_pad), jnp.float32).at[:, :A].set(b2.astype(jnp.float32))
    return w1_c, b1_c, w2_p, b2_p


@partial(jax.jit, static_argnames=("action_size", "tile_b", "out_dtype"))
def dqn_forward(x, w1, b1, w2_p, b2_p, *, action_size, tile_b=None, out_dtype=None):
    """relu(x @ W1 + b1) @ W2 + b2 in a single fused Pallas kernel.

    x:    [B, state_size]
    w1:   [state_size, hidden]  (MXU dtype, from prepare_params)
    b1:   [1, hidden]           (f32)
    w2_p: [hidden, n_pad]       (MXU dtype, lane-padded)
    b2_p: [1, n_pad]            (f32, lane-padded)
    """
    B, K = x.shape
    H = w1.shape[1]
    n_pad = w2_p.shape[1]
    if out_dtype is None:
        out_dtype = x.dtype

    # Cast activations to the MXU dtype (weights already cast in prepare_params).
    x_mxu = x if x.dtype == w1.dtype else x.astype(w1.dtype)

    # Batch tiling: big tiles to amortize per-step overhead, but >=2 tiles when
    # B > 8 so both v7x TensorCores get work on the "parallel" batch axis.
    if tile_b is None:
        if B <= SUBLANE:
            tile_b = B                                   # single full-batch tile
        else:
            tile_b = min(2048, _round_up(pl.cdiv(B, 2), SUBLANE))
    grid = (pl.cdiv(B, tile_b),)                         # partial last tile is masked

    out = pl.pallas_call(
        dqn_kernel,
        out_shape=jax.ShapeDtypeStruct((B, n_pad), out_dtype),
        grid=grid,
        in_specs=[
            pl.BlockSpec((tile_b, K), lambda i: (i, 0)),   # x: tiled over batch
            pl.BlockSpec((K, H), lambda i: (0, 0)),        # W1: constant -> VMEM-resident
            pl.BlockSpec((1, H), lambda i: (0, 0)),        # b1
            pl.BlockSpec((H, n_pad), lambda i: (0, 0)),    # W2 (lane-padded)
            pl.BlockSpec((1, n_pad), lambda i: (0, 0)),    # b2 (lane-padded)
        ],
        out_specs=pl.BlockSpec((tile_b, n_pad), lambda i: (i, 0)),
        compiler_params=pltpu.CompilerParams(
            dimension_semantics=("parallel",)),            # shard batch tiles across TCs
    )(x_mxu, w1, b1, w2_p, b2_p)

    # Only the lane padding is sliced off (no batch padding was materialized).
    return out[:, :action_size]


def init_params(key, state_size, action_size, hidden_size=256):
    # Mimics PyTorch's default nn.Linear init (uniform in +/- 1/sqrt(fan_in));
    # weights stored pre-transposed as [in_features, out_features].
    k1, k2, k3, k4 = jax.random.split(key, 4)
    bound1 = 1.0 / jnp.sqrt(state_size)
    bound2 = 1.0 / jnp.sqrt(hidden_size)
    w1 = jax.random.uniform(k1, (state_size, hidden_size), jnp.float32, -bound1, bound1)
    b1 = jax.random.uniform(k2, (1, hidden_size), jnp.float32, -bound1, bound1)
    w2 = jax.random.uniform(k3, (hidden_size, action_size), jnp.float32, -bound2, bound2)
    b2 = jax.random.uniform(k4, (1, action_size), jnp.float32, -bound2, bound2)
    return w1, b1, w2, b2


if __name__ == "__main__":
    state_size = 16
    action_size = 8
    hidden_size = 256
    batch = 8

    key = jax.random.PRNGKey(0)
    kx, kp = jax.random.split(key)
    x = jax.random.normal(kx, (batch, state_size), jnp.float32)
    w1, b1, w2, b2 = init_params(kp, state_size, action_size, hidden_size)

    # One-time prep (padding + bf16 cast hoisted out of the forward hot path).
    w1_c, b1_c, w2_p, b2_p = prepare_params(w1, b1, w2, b2)

    out = dqn_forward(x, w1_c, b1_c, w2_p, b2_p, action_size=action_size)
    jax.block_until_ready(out)
    assert out.shape == (batch, action_size)

    # Reference 1: same precision path (bf16 operands, f32 accumulation).
    xb = x.astype(jnp.bfloat16)
    w1b = w1.astype(jnp.bfloat16)
    w2b = w2.astype(jnp.bfloat16)
    h_ref = jnp.maximum(
        jnp.dot(xb, w1b, preferred_element_type=jnp.float32) + b1, 0.0)
    ref_same = jnp.dot(h_ref.astype(jnp.bfloat16), w2b,
                       preferred_element_type=jnp.float32) + b2
    assert jnp.allclose(out, ref_same, atol=2e-3, rtol=2e-3), "mismatch vs bf16-path reference"

    # Reference 2: full f32 reference (loose tolerance due to bf16 MXU operands).
    ref_f32 = jnp.maximum(x @ w1 + b1, 0.0) @ w2 + b2
    assert jnp.allclose(out, ref_f32, atol=5e-2, rtol=5e-2), "mismatch vs f32 reference"

    print("KERNEL_OK")
</pallas_src>

<mosaic_0001>
module attributes {stable_mosaic.version = 11 : i64} {
  func.func @dqn_kernel(%arg0: i32, %arg1: memref<8x16xbf16, #tpu.memory_space<vmem>>, %arg2: memref<16x256xbf16, #tpu.memory_space<vmem>>, %arg3: memref<1x256xf32, #tpu.memory_space<vmem>>, %arg4: memref<256x128xbf16, #tpu.memory_space<vmem>>, %arg5: memref<1x128xf32, #tpu.memory_space<vmem>>, %arg6: memref<8x128xf32, #tpu.memory_space<vmem>>) attributes {dimension_semantics = [#tpu.dimension_semantics<parallel>], iteration_bounds = array<i64: 1>, scalar_prefetch = 0 : i64, scratch_operands = 0 : i64, tpu.core_type = #tpu.core_type<tc>, window_params = [{transform_indices = @transform_0, window_bounds = array<i64: 8, 16>}, {pipeline_mode = #tpu.pipeline_mode<synchronous>, transform_indices = @transform_1, window_bounds = array<i64: 16, 256>}, {pipeline_mode = #tpu.pipeline_mode<synchronous>, transform_indices = @transform_2, window_bounds = array<i64: 1, 256>}, {pipeline_mode = #tpu.pipeline_mode<synchronous>, transform_indices = @transform_3, window_bounds = array<i64: 256, 128>}, {pipeline_mode = #tpu.pipeline_mode<synchronous>, transform_indices = @transform_4, window_bounds = array<i64: 1, 128>}, {transform_indices = @transform_5, window_bounds = array<i64: 8, 128>}]} {
    %c0 = arith.constant 0 : index
    %c0_0 = arith.constant 0 : index
    %0 = vector.load %arg1[%c0, %c0_0] : memref<8x16xbf16, #tpu.memory_space<vmem>>, vector<8x16xbf16>
    %c0_1 = arith.constant 0 : index
    %c0_2 = arith.constant 0 : index
    %1 = vector.load %arg2[%c0_1, %c0_2] : memref<16x256xbf16, #tpu.memory_space<vmem>>, vector<16x256xbf16>
    %cst = arith.constant dense<0.000000e+00> : vector<8x256xf32>
    %2 = tpu.matmul %0, %1, %cst {dimension_numbers = #tpu.dot_dimension_numbers<[1], [0], [0], [1], [0, 0, 1, 1], [], []>} : vector<8x16xbf16>, vector<16x256xbf16>, vector<8x256xf32> -> vector<8x256xf32>
    %c0_3 = arith.constant 0 : index
    %c0_4 = arith.constant 0 : index
    %3 = vector.load %arg3[%c0_3, %c0_4] : memref<1x256xf32, #tpu.memory_space<vmem>>, vector<1x256xf32>
    %4 = vector.broadcast %3 : vector<1x256xf32> to vector<8x256xf32>
    %5 = arith.addf %2, %4 : vector<8x256xf32>
    %cst_5 = arith.constant 0.000000e+00 : f32
    %6 = vector.broadcast %cst_5 : f32 to vector<8x256xf32>
    %7 = arith.maximumf %5, %6 : vector<8x256xf32>
    %8 = arith.truncf %7 : vector<8x256xf32> to vector<8x256xbf16>
    %c0_6 = arith.constant 0 : index
    %c0_7 = arith.constant 0 : index
    %9 = vector.load %arg4[%c0_6, %c0_7] : memref<256x128xbf16, #tpu.memory_space<vmem>>, vector<256x128xbf16>
    %cst_8 = arith.constant dense<0.000000e+00> : vector<8x128xf32>
    %10 = tpu.matmul %8, %9, %cst_8 {dimension_numbers = #tpu.dot_dimension_numbers<[1], [0], [0], [1], [0, 0, 1, 1], [], []>} : vector<8x256xbf16>, vector<256x128xbf16>, vector<8x128xf32> -> vector<8x128xf32>
    %c0_9 = arith.constant 0 : index
    %c0_10 = arith.constant 0 : index
    %11 = vector.load %arg5[%c0_9, %c0_10] : memref<1x128xf32, #tpu.memory_space<vmem>>, vector<1x128xf32>
    %12 = vector.broadcast %11 : vector<1x128xf32> to vector<8x128xf32>
    %13 = arith.addf %10, %12 : vector<8x128xf32>
    %c0_11 = arith.constant 0 : index
    %c0_12 = arith.constant 0 : index
    %14 = vector.load %arg6[%c0_11, %c0_12] : memref<8x128xf32, #tpu.memory_space<vmem>>, vector<8x128xf32>
    tpu.vector_store %arg6[%c0_11, %c0_12], %13 {strides = array<i32>} : memref<8x128xf32, #tpu.memory_space<vmem>>, vector<8x128xf32>,
    return
  }
  func.func @transform_0(%arg0: i32) -> (i32, i32) {
    %c0_i32 = arith.constant 0 : i32
    %c0_i32_0 = arith.constant 0 : i32
    return %arg0, %c0_i32 : i32, i32
  }
  func.func @transform_1(%arg0: i32) -> (i32, i32) {
    %c0_i32 = arith.constant 0 : i32
    %c0_i32_0 = arith.constant 0 : i32
    %c0_i32_1 = arith.constant 0 : i32
    return %c0_i32, %c0_i32_0 : i32, i32
  }
  func.func @transform_2(%arg0: i32) -> (i32, i32) {
    %c0_i32 = arith.constant 0 : i32
    %c0_i32_0 = arith.constant 0 : i32
    %c0_i32_1 = arith.constant 0 : i32
    return %c0_i32, %c0_i32_0 : i32, i32
  }
  func.func @transform_3(%arg0: i32) -> (i32, i32) {
    %c0_i32 = arith.constant 0 : i32
    %c0_i32_0 = arith.constant 0 : i32
    %c0_i32_1 = arith.constant 0 : i32
    return %c0_i32, %c0_i32_0 : i32, i32
  }
  func.func @transform_4(%arg0: i32) -> (i32, i32) {
    %c0_i32 = arith.constant 0 : i32
    %c0_i32_0 = arith.constant 0 : i32
    %c0_i32_1 = arith.constant 0 : i32
    return %c0_i32, %c0_i32_0 : i32, i32
  }
  func.func @transform_5(%arg0: i32) -> (i32, i32) {
    %c0_i32 = arith.constant 0 : i32
    %c0_i32_0 = arith.constant 0 : i32
    return %arg0, %c0_i32 : i32, i32
  }
}

</mosaic_0001>

<bundles_post_ra>
// kernel: dqn_forward.1
= control target key start
LH: loop header
LB: loop body
LE: loop exit
PB: predicated region body
PF: predicated region fallthrough
CT: control target
= control target key end

     0   :  { %10 = vsyncpa [#allocation3], 0  ;;  %s517_s0 = inlined_call_operand.vmem [shape: bf16[8,16], index: 0, kind: input, shape index: {}]   ;;  %s518_s1 = inlined_call_operand.hbm [shape: bf16[16,256], index: 1, kind: input, shape index: {}]   ;;  %s519_s2 = inlined_call_operand.vmem [shape: f32[1,256], index: 2, kind: input, shape index: {}]   ;;  %s520_s3 = inlined_call_operand.hbm [shape: bf16[256,128], index: 3, kind: input, shape index: {}]   ;;  %s521_s4 = inlined_call_operand.vmem [shape: f32[1,128], index: 4, kind: input, shape index: {}]   ;;  %s522_s5 = inlined_call_operand.hbm [shape: f32[8,128], index: 5, kind: output, shape index: {}]  }
   0x1   :  { %11 = vsyncpa [#allocation6], 0 }
   0x2   :  { %12 = vsyncpa [#allocation4], 0  ;;  %s19_s20 = sshll.u32 %s518_s1, 4  ;;  %s462_s21 = smov [#allocation2]   ;;  %s20_s20 = int_to_ptr.hbm [resolvable:$true] %s19_s20 }
   0x3   :  { %s21_s22 = sshll.u32 %s462_s21, 4  ;;  %s34_s25 = sshll.u32 %s520_s3, 4  ;;  %s22_s22 = int_to_ptr.vmem [resolvable:$true] %s21_s22  ;;  %s35_s25 = int_to_ptr.hbm [resolvable:$true] %s34_s25 }
   0x4   :  { %s463_s26 = smov 128   ;;  %s464_s27 = smov 8  }
   0x5   :  { %27 = dma.hbm_to_vmem [thread:$0]  %s20_s20, 256, %s22_s22, [#allocation3], %s463_s26, %s463_s26, %s464_s27  }
   0x6   :  { %s465_s28 = smov [#allocation5]   ;;  %s466_s30 = smov 64  }
   0x7   :  { %s36_s29 = sshll.u32 %s465_s28, 4  ;;  %s467_s6 = smov 4   ;;  %s37_s29 = int_to_ptr.vmem [resolvable:$true] %s36_s29 }
   0x8   :  { %42 = dma.hbm_to_vmem [thread:$0]  %s35_s25, 2048, %s37_s29, [#allocation6], %s466_s30, %s466_s30, %s467_s6  }
   0x9   :  { %456 = dma.done.wait [#allocation3], 256  }
   0xa   :  { %457 = vsyncadd [#allocation3], 4294967040 }
   0xb   :  { %458 = dma.done.wait [#allocation6], 2048  }
   0xc   :  { %459 = vsyncadd [#allocation6], 4294965248  ;;  %v286_v0 = vld [vmem:[#allocation2] sm:$0xf]  ;;  %v359_v1 = vld [vmem:[#allocation2 + $0x4] sm:$0xf0] }
   0xd   :  { %v358_v2 = vld [vmem:[#allocation2 + $0x4] sm:$0xf]  ;;  %v287_v3 = vor.u32 %v359_v1, %v286_v0  ;;  %v288_v4 = vld [vmem:[#allocation2 + $0x8] sm:$0xf0]  ;;  %v54_v8 = vld [vmem:[%s517_s0] sm:$0xf] }
   0xe   :  { %v367_v5 = vld [vmem:[#allocation5 + $0x38] sm:$0xff]  ;;  %v291_v6 = vor.u32 %v358_v2, %v288_v4  ;;  %vm73_vm0 = vcmask 130048   ;;  %v366_v9 = vld [vmem:[#allocation5 + $0x30] sm:$0xff]  ;;  %v365_v11 = vld [vmem:[#allocation5 + $0x28] sm:$0xff]  ;;  %s273_s13 = sshll.u32 %s522_s5, 4  ;;  %s274_s13 = int_to_ptr.hbm [resolvable:$true] %s273_s13 }
   0xf   :  { %v375_v7 = vld [vmem:[#allocation5 + $0x78] sm:$0xff]  ;;  %84 = vmatpush.bf16.msra.mxu0 %v287_v3  ;;  %239 = vmatpush.bf16.msra.mxu2 %v367_v5  ;;  %v374_v10 = vld [vmem:[#allocation5 + $0x70] sm:$0xff]  ;;  %v373_v12 = vld [vmem:[#allocation5 + $0x68] sm:$0xff] }
  0x10   :  { %97 = vmatpush.bf16.msra.mxu1 %v291_v6  ;;  %252 = vmatpush.bf16.msra.mxu3 %v375_v7  ;;  %v364_v13 = vld [vmem:[#allocation5 + $0x20] sm:$0xff]  ;;  %v363_v15 = vld [vmem:[#allocation5 + $0x18] sm:$0xff]  ;;  %v362_v17 = vld [vmem:[#allocation5 + $0x10] sm:$0xff] }
  0x11   :  { %v372_v14 = vld [vmem:[#allocation5 + $0x60] sm:$0xff]  ;;  %v371_v16 = vld [vmem:[#allocation5 + $0x58] sm:$0xff]  ;;  %v370_v18 = vld [vmem:[#allocation5 + $0x50] sm:$0xff] }
  0x12   :  { %292 = vmatmul.msk.bf16.vlgmr.msra.gmra.mxu0 %vm73_vm0, %v54_v8  ;;  %v361_v19 = vld [vmem:[#allocation5 + $0x8] sm:$0xff]  ;;  %v360_v21 = vld [vmem:[#allocation5] sm:$0xff]  ;;  %v57_v23 = vld [vmem:[%s519_s2] sm:$0x3]  ;;  %s468_s2 = smov [#allocation7]  }
  0x13   :  { %293 = vmatmul.msk.bf16.vlgmr.msra.gmra.mxu1 %vm73_vm0, %v54_v8  ;;  %240 = vmatpush.bf16.msra.mxu2 %v366_v9  ;;  %v369_v20 = vld [vmem:[#allocation5 + $0x48] sm:$0xff]  ;;  %v368_v22 = vld [vmem:[#allocation5 + $0x40] sm:$0xff]  ;;  %v59_v24 = vperm.slane %v57_v23, 0  ;;  %v60_v25 = vperm.slane %v57_v23, 1  ;;  %v383_v36 = vld [vmem:[%s521_s4] ss:$0 sm:$0xff] }
  0x14   :  { %253 = vmatpush.bf16.msra.mxu3 %v374_v10  ;;  %s271_s10 = sshll.u32 %s468_s2, 4  ;;  %s272_s10 = int_to_ptr.vmem [resolvable:$true] %s271_s10 }
  0x17   :  { %241 = vmatpush.bf16.msra.mxu2 %v365_v11 }
  0x18   :  { %254 = vmatpush.bf16.msra.mxu3 %v373_v12 }
  0x1b   :  { %242 = vmatpush.bf16.msra.mxu2 %v364_v13 }
  0x1c   :  { %255 = vmatpush.bf16.msra.mxu3 %v372_v14 }
  0x1f   :  { %243 = vmatpush.bf16.msra.mxu2 %v363_v15 }
  0x20   :  { %256 = vmatpush.bf16.msra.mxu3 %v371_v16 }
  0x23   :  { %244 = vmatpush.bf16.msra.mxu2 %v362_v17 }
  0x24   :  { %257 = vmatpush.bf16.msra.mxu3 %v370_v18 }
  0x27   :  { %245 = vmatpush.bf16.msra.mxu2 %v361_v19 }
  0x28   :  { %258 = vmatpush.bf16.msra.mxu3 %v369_v20 }
  0x2b   :  { %246 = vmatpush.bf16.msra.mxu2 %v360_v21 }
  0x2c   :  { %259 = vmatpush.bf16.msra.mxu3 %v368_v22 }
  0x8f   :  { %v86_v26 = vpop.f32.mrf.mxu0 }
  0x90   :  { %v87_v27 = vadd.f32 %v86_v26, %v59_v24  ;;  %v99_v28 = vpop.f32.mrf.mxu1 }
  0x91   :  { %v100_v29 = vadd.f32 %v99_v28, %v60_v25 }
  0x92   :  { %v103_v30 = vmax.f32 %v87_v27, 0.0 }
  0x93   :  { %v104_v31 = vmax.f32 %v100_v29, 0.0 }
  0x94   :  { %v105_v32 = vpack.c.bf16 %v103_v30, %v103_v30 }
  0x95   :  { %v106_v33 = vpack.c.bf16 %v104_v31, %v104_v31 }
  0x96   :  { %247 = vmatmul.bf16.vlgmr.msra.gmra.mxu2 %v105_v32 }
  0x97   :  { %260 = vmatmul.bf16.vlgmr.msra.gmra.mxu3 %v106_v33  ;;  %v88_v34 = vpop.f32.mrf.mxu0 }
  0x98   :  { %v101_v35 = vpop.f32.mrf.mxu1 }
 0x119   :  { %v248_v37 = vpop.f32.mrf.mxu2 }
 0x11a   :  { %v249_v38 = vadd.f32 %v383_v36, %v248_v37  ;;  %v261_v39 = vpop.f32.mrf.mxu3 }
 0x11c   :  { %v262_v40 = vadd.f32 %v261_v39, %v249_v38 }
 0x11e   :  { %265 = vst [vmem:[#allocation7] sm:$0xff] %v262_v40 }
 0x11f   :  { %276 = dma.vmem_to_hbm [thread:$0]  %s272_s10, 128, %s274_s13, [#allocation4]  }
 0x121   :  { %v250_v41 = vpop.f32.mrf.mxu2 }
 0x122   :  { %v263_v42 = vpop.f32.mrf.mxu3 }
 0x123   :  { %460 = dma.done.wait [#allocation4], 128  }
 0x124   :  { %461 = vsyncadd [#allocation4], 4294967168 }
 0x125   :  { %281 = vsyncpa [#allocation3], 1 }
 0x126   :  { %282 = vsyncpa [#allocation6], 1 }
 0x127   :  { %283 = vsyncpa [#allocation4], 1 }

</bundles_post_ra>
